<compile_context>
chip_gen: v6e
topology: v6e:2x2x1
jax: 0.10.0
libtpu: 0.0.40
codegen_flags: <defaults>
</compile_context>

<pallas_src>
import math

import jax
import jax.numpy as jnp
from jax.experimental import pallas as pl
from jax.experimental.pallas import tpu as pltpu

_COEFF = 1.0 / math.sqrt(2.0 * math.pi)

_LANES = 128
# Inputs up to this many bytes run as one gridless full-extent block.  Kept
# small so medium inputs get pipelined (overlapped) DMAs and, on v7x, >= 2
# parallel grid blocks.
_SINGLE_BLOCK_MAX_BYTES = 256 * 1024
# ~2 MiB per tile in the grid path (see header comment).
_TARGET_TILE_BYTES = 2 * 1024 * 1024


def _min_sublanes(dtype) -> int:
    # Native sublane tiling: f32 -> 8, bf16 -> 16, int8/fp8 -> 32.
    itemsize = jnp.dtype(dtype).itemsize
    return {4: 8, 2: 16, 1: 32}.get(itemsize, 8)


def _round_up(x: int, m: int) -> int:
    return pl.cdiv(x, m) * m


# ---------------------------------------------------------------------------
# RBFKernelStd: elementwise exp(-0.5*x*x) * C
# ---------------------------------------------------------------------------
def _rbf_kernel(x_ref, o_ref):
    x = x_ref[...]
    # exp -> EUP; mul/neg -> VPU elementwise.
    o_ref[...] = jnp.exp(-0.5 * x * x) * jnp.asarray(_COEFF, x.dtype)


def rbf_kernel_std(x: jax.Array) -> jax.Array:
    """RBFKernelStd.forward: exp(-0.5 * x * x) / sqrt(2*pi), elementwise.

    NOTE: a standalone Pallas call only pays off for biggish tensors; for tiny
    inputs an XLA-fused jnp.exp(-0.5*x*x)*C would avoid the dispatch/DMA
    overhead.  The Pallas path is kept unconditionally so the kernel itself is
    exercised here.
    """
    orig_shape = x.shape
    dtype = x.dtype
    n = x.size
    itemsize = jnp.dtype(dtype).itemsize
    min_rows = _min_sublanes(dtype)

    flat = x.reshape(-1)

    # Lane-dense (rows, 128) view.  Pad only when n is not a multiple of 128
    # (and then by < 128 elements); no whole-tile rounding.
    rows = pl.cdiv(n, _LANES)
    n_pad = rows * _LANES
    padded = n_pad != n
    if padded:
        flat = jnp.pad(flat, (0, n_pad - n))
    x2d = flat.reshape(rows, _LANES)

    nbytes = rows * _LANES * itemsize
    if nbytes <= _SINGLE_BLOCK_MAX_BYTES:
        # Small path: one full-extent block, no grid.
        out2d = pl.pallas_call(
            _rbf_kernel,
            out_shape=jax.ShapeDtypeStruct((rows, _LANES), dtype),
        )(x2d)
    else:
        # Grid path: big lane-dense tiles, >= 2 blocks, partial final block
        # handled by Pallas masking (no data padding to a whole tile).
        max_rows = max(min_rows, _TARGET_TILE_BYTES // (_LANES * itemsize))
        block_rows = min(max_rows, _round_up(pl.cdiv(rows, 2), min_rows))
        grid = pl.cdiv(rows, block_rows)
        out2d = pl.pallas_call(
            _rbf_kernel,
            out_shape=jax.ShapeDtypeStruct((rows, _LANES), dtype),
            grid=(grid,),
            in_specs=[pl.BlockSpec((block_rows, _LANES), lambda i: (i, 0))],
            out_specs=pl.BlockSpec((block_rows, _LANES), lambda i: (i, 0)),
            compiler_params=pltpu.CompilerParams(
                dimension_semantics=("parallel",),
            ),
        )(x2d)

    out_flat = out2d.reshape(-1)
    if padded:
        out_flat = out_flat[:n]
    return out_flat.reshape(orig_shape)


# ---------------------------------------------------------------------------
# Full RBF.forward: y = Linear(exp(-0.5*(a*x+b)^2) * C)
# ---------------------------------------------------------------------------
def _rbf_forward_kernel(x_ref, a_ref, b_ref, w_ref, bias_ref, o_ref):
    x = x_ref[...]                                   # (N, 1)
    z = a_ref[...] * x + b_ref[...]                  # (N, P) via broadcast
    g = jnp.exp(-0.5 * z * z) * jnp.asarray(_COEFF, z.dtype)
    # Weighted lane reduction (XLU) + bias; padded lanes have w == 0.
    o_ref[...] = jnp.sum(g * w_ref[...], axis=-1, keepdims=True) + bias_ref[...]


def rbf_forward(x: jax.Array, a: jax.Array, b: jax.Array,
                w: jax.Array, bias) -> jax.Array:
    """RBF.forward fused in one single-block kernel.

    x: (N, 1); a, b: (P,); w: (P,) = linear.weight[0]; bias: scalar.
    Returns y: (N, 1).
    """
    n = x.shape[0]
    p = a.shape[0]
    p_pad = _round_up(p, _LANES)
    if p_pad != p:
        pad = (0, p_pad - p)
        a = jnp.pad(a, pad)
        b = jnp.pad(b, pad)
        w = jnp.pad(w, pad)   # zero-padded weights -> padded lanes contribute 0
    a2 = a.reshape(1, p_pad)
    b2 = b.reshape(1, p_pad)
    w2 = w.reshape(1, p_pad)
    bias2 = jnp.asarray(bias, jnp.float32).reshape(1, 1)
    return pl.pallas_call(
        _rbf_forward_kernel,
        out_shape=jax.ShapeDtypeStruct((n, 1), x.dtype),
    )(x, a2, b2, w2, bias2)


if __name__ == "__main__":
    key = jax.random.PRNGKey(0)
    k1, k2, k3, k4, k5, k6, k7 = jax.random.split(key, 7)

    # ---- RBFKernelStd: primary (2,4,16,16) case (small, gridless path) ----
    x = jax.random.normal(k1, (2, 4, 16, 16), dtype=jnp.float32)
    y = rbf_kernel_std(x)
    jax.block_until_ready(y)
    y_ref = jnp.exp(-0.5 * x * x) * _COEFF
    assert y.shape == x.shape and y.dtype == x.dtype
    assert jnp.allclose(y, y_ref, atol=1e-6, rtol=1e-6)

    # ---- grid path: 2 even ~1.25 MiB blocks, no pad / no slice ----
    x_big = jax.random.normal(k2, (640, 1024), dtype=jnp.float32)
    y_big = rbf_kernel_std(x_big)
    jax.block_until_ready(y_big)
    assert jnp.allclose(y_big, jnp.exp(-0.5 * x_big * x_big) * _COEFF,
                        atol=1e-6, rtol=1e-6)

    # ---- grid path, ragged size: <128-elem pad + masked partial final block ----
    x_rag = jax.random.normal(k3, (513, 257), dtype=jnp.float32)
    y_rag = rbf_kernel_std(x_rag)
    jax.block_until_ready(y_rag)
    assert jnp.allclose(y_rag, jnp.exp(-0.5 * x_rag * x_rag) * _COEFF,
                        atol=1e-6, rtol=1e-6)

    # ---- bf16 input (computed in bf16, matching weak-typed torch behavior) ----
    x_bf = jax.random.normal(k4, (4, 4, 16, 32), dtype=jnp.bfloat16)
    y_bf = rbf_kernel_std(x_bf)
    jax.block_until_ready(y_bf)
    y_bf_ref = jnp.exp(-0.5 * x_bf.astype(jnp.float32) ** 2) * _COEFF
    assert y_bf.dtype == jnp.bfloat16
    assert jnp.allclose(y_bf.astype(jnp.float32), y_bf_ref, atol=3e-2, rtol=1e-1)

    # ---- full RBF.forward (a*x + b -> kernel -> linear), n_params=1000 ----
    n_params, batch = 1000, 8
    a = 0.2 * jax.random.normal(k5, (n_params,), dtype=jnp.float32)
    b = 0.2 * jax.random.normal(k6, (n_params,), dtype=jnp.float32)
    w = 0.2 * jax.random.normal(k7, (n_params,), dtype=jnp.float32)
    bias = jnp.float32(0.1)
    xf = jax.random.normal(jax.random.PRNGKey(1), (batch, 1), dtype=jnp.float32)
    yf = rbf_forward(xf, a, b, w, bias)
    jax.block_until_ready(yf)
    g_ref = jnp.exp(-0.5 * (a * xf + b) ** 2) * _COEFF
    yf_ref = jnp.sum(g_ref * w, axis=-1, keepdims=True) + bias
    assert yf.shape == (batch, 1)
    assert jnp.allclose(yf, yf_ref, atol=2e-4, rtol=1e-3)

    print("KERNEL_OK")
</pallas_src>

<mosaic_0001>
module attributes {stable_mosaic.version = 11 : i64} {
  func.func @_rbf_kernel(%arg0: memref<16x128xf32, #tpu.memory_space<vmem>>, %arg1: memref<16x128xf32, #tpu.memory_space<vmem>>) attributes {dimension_semantics = [], scalar_prefetch = 0 : i64, scratch_operands = 0 : i64, tpu.core_type = #tpu.core_type<tc>} {
    %c0 = arith.constant 0 : index
    %c0_0 = arith.constant 0 : index
    %0 = vector.load %arg0[%c0, %c0_0] : memref<16x128xf32, #tpu.memory_space<vmem>>, vector<16x128xf32>
    %cst = arith.constant -5.000000e-01 : f32
    %1 = vector.broadcast %cst : f32 to vector<16x128xf32>
    %2 = arith.mulf %1, %0 : vector<16x128xf32>
    %3 = arith.mulf %2, %0 : vector<16x128xf32>
    %4 = math.exp %3 : vector<16x128xf32>
    %cst_1 = arith.constant 0.398942292 : f32
    %5 = vector.broadcast %cst_1 : f32 to vector<16x128xf32>
    %6 = arith.mulf %4, %5 : vector<16x128xf32>
    %c0_2 = arith.constant 0 : index
    %c0_3 = arith.constant 0 : index
    %7 = vector.load %arg1[%c0_2, %c0_3] : memref<16x128xf32, #tpu.memory_space<vmem>>, vector<16x128xf32>
    tpu.vector_store %arg1[%c0_2, %c0_3], %6 {strides = array<i32>} : memref<16x128xf32, #tpu.memory_space<vmem>>, vector<16x128xf32>,
    return
  }
}

</mosaic_0001>

<bundles_post_ra>
// kernel: tpu_custom_call.1
= control target key start
LH: loop header
LB: loop body
LE: loop exit
PB: predicated region body
PF: predicated region fallthrough
CT: control target
= control target key end

     0   :  { %6 = vsyncpa [#allocation3], 0  ;;  %s132_s0 = inlined_call_operand.hbm [shape: f32[16,128], index: 0, kind: input, shape index: {}]   ;;  %s133_s1 = inlined_call_operand.hbm [shape: f32[16,128], index: 1, kind: output, shape index: {}]  }
   0x1   :  { %7 = vsyncpa [#allocation4], 0  ;;  %s106_s6 = smov [#allocation2]  }
   0x2   :  { %s13_s7 = sshll.u32 %s106_s6, 4  ;;  %s14_s7 = int_to_ptr.vmem [resolvable:$true] %s13_s7 }
   0x3   :  { %s70_s8 = scalar_lea.vmem %s14_s7, 256  ;;  %p75_p1 = scmp.lt.s32.totalorder %s14_s7, %s14_s7 }
   0x4   :  { %p71_p0 = scmp.ne.s32.totalorder %s14_s7, %s70_s8  ;;  %p76_p2 = scmp.lt.s32.totalorder %s70_s8, %s70_s8 }
   0x6   :  { %p77_p3 = por %p76_p2, %p75_p1 }
   0x8   :  { %p78_p4 = pnand %p77_p3, %p71_p0 }
   0xa   :  { %81 = shalt.err (!%p78_p4)
}
   0xb   :  { %s107_s9 = smov 128   ;;  %s108_s10 = smov 8  }
   0xc   :  { %19 = dma.hbm_to_vmem [thread:$0]  %s132_s0, 256, %s14_s7, [#allocation3], %s107_s9, %s107_s9, %s108_s10  }
   0xd   :  { %102 = dma.done.wait [#allocation3], 256  }
   0xe   :  { %103 = vsyncadd [#allocation3], 4294967040  ;;  %v23_v0 = vld [vmem:[#allocation2] sm:$0xff]  ;;  %v24_v1 = vld [vmem:[#allocation2 + $0x8] sm:$0xff]  ;;  %s109_s13 = smov [#allocation5]  }
   0xf   :  { %v25_v2 = vmul.f32 -0.5, %v23_v0  ;;  %v26_v3 = vmul.f32 -0.5, %v24_v1  ;;  %s42_s14 = sshll.u32 %s109_s13, 4  ;;  %s43_s14 = int_to_ptr.vmem [resolvable:$true] %s42_s14 }
  0x10   :  { %s82_s0 = scalar_lea.vmem %s43_s14, 256  ;;  %p87_p6 = scmp.lt.s32.totalorder %s43_s14, %s43_s14 }
  0x11   :  { %v27_v4 = vmul.f32 %v25_v2, %v23_v0  ;;  %v28_v5 = vmul.f32 %v26_v3, %v24_v1  ;;  %p83_p5 = scmp.ne.s32.totalorder %s43_s14, %s82_s0  ;;  %p88_p7 = scmp.lt.s32.totalorder %s82_s0, %s82_s0 }
  0x13   :  { %v29_v6 = vmul.f32 1.442695, %v27_v4  ;;  %v31_v7 = vmul.f32 1.442695, %v28_v5  ;;  %p89_p8 = por %p88_p7, %p87_p6 }
  0x15   :  { %58 = vpow2.f32 %v29_v6  ;;  %p90_p9 = pnand %p89_p8, %p83_p5 }
  0x16   :  { %60 = vpow2.f32 %v31_v7 }
  0x22   :  { %v59_v8 = vpop.eup %58 }
  0x23   :  { %v61_v9 = vpop.eup %60  ;;  %v33_v10 = vmul.f32 0.3989423, %v59_v8 }
  0x24   :  { %v34_v11 = vmul.f32 0.3989423, %v61_v9 }
  0x25   :  { %35 = vst [vmem:[#allocation5] sm:$0xff] %v33_v10 }
  0x26   :  { %36 = vst [vmem:[#allocation5 + $0x8] sm:$0xff] %v34_v11 }
  0x27   :  { %93 = shalt.err (!%p90_p9)
}
  0x28   :  { %48 = dma.vmem_to_hbm [thread:$0]  %s43_s14, 256, %s133_s1, [#allocation4], %s107_s9, %s107_s9, %s108_s10  }
  0x29   :  { %104 = dma.done.wait [#allocation4], 256  }
  0x2a   :  { %105 = vsyncadd [#allocation4], 4294967040 }
  0x2b   :  { %52 = vsyncpa [#allocation3], 1 }
  0x2c   :  { %53 = vsyncpa [#allocation4], 1 }

</bundles_post_ra>
